<compile_context>
chip_gen: v7x
topology: tpu7x:2x2x1
jax: 0.10.0
libtpu: 0.0.40
codegen_flags: <defaults>
</compile_context>

<pallas_src>
import functools
import math

import jax
import jax.numpy as jnp
from jax.experimental import pallas as pl
from jax.experimental.pallas import tpu as pltpu

_VMEM_LIMIT = 48 * 1024 * 1024   # leave headroom below v7x's 64 MiB physical VMEM
_MASK_VALUE = -1e30              # finite mask fill (causal diagonal is never masked)


# ----------------------------------------------------------------------------
# Kernel 1: fused per-head QKV projection.
#   grid = (B, t_tiles, H)  (x block is resident across the innermost h axis)
#   x_ref : (1, tt, C) f32        w_ref : (1, C, 3*HS) bf16  [Wq*scale | Wk | Wv]
#   q/k/v_ref : (1, 1, tt, HS) bf16, head-split layout (B, H, T, HS)
# ----------------------------------------------------------------------------
def _qkv_proj_kernel(x_ref, w_ref, q_ref, k_ref, v_ref, *, head_size,
                     compute_dtype):
    x = x_ref[0].astype(compute_dtype)                         # (tt, C)
    w = w_ref[0]                                               # (C, 3*HS) bf16
    qkv = jnp.dot(x, w, preferred_element_type=jnp.float32)    # (tt, 3*HS) f32
    hs = head_size
    q_ref[0, 0] = qkv[:, :hs].astype(q_ref.dtype)
    k_ref[0, 0] = qkv[:, hs:2 * hs].astype(k_ref.dtype)
    v_ref[0, 0] = qkv[:, 2 * hs:].astype(v_ref.dtype)


def qkv_proj(x, wqkv, num_heads, head_size, *, compute_dtype=jnp.bfloat16,
             tile_t=256):
    B, T, C = x.shape
    tt = min(tile_t, T)
    assert T % tt == 0, "T must be divisible by the QKV row tile"
    kernel = functools.partial(_qkv_proj_kernel, head_size=head_size,
                               compute_dtype=compute_dtype)
    out_sds = jax.ShapeDtypeStruct((B, num_heads, T, head_size), compute_dtype)
    return pl.pallas_call(
        kernel,
        out_shape=(out_sds, out_sds, out_sds),
        grid_spec=pltpu.PrefetchScalarGridSpec(
            num_scalar_prefetch=0,
            grid=(B, T // tt, num_heads),
            in_specs=[
                pl.BlockSpec((1, tt, C), lambda b, t, h: (b, t, 0)),
                pl.BlockSpec((1, C, 3 * head_size), lambda b, t, h: (h, 0, 0)),
            ],
            out_specs=(
                pl.BlockSpec((1, 1, tt, head_size), lambda b, t, h: (b, h, t, 0)),
                pl.BlockSpec((1, 1, tt, head_size), lambda b, t, h: (b, h, t, 0)),
                pl.BlockSpec((1, 1, tt, head_size), lambda b, t, h: (b, h, t, 0)),
            ),
        ),
        compiler_params=pltpu.CompilerParams(
            dimension_semantics=("parallel", "parallel", "parallel"),
            vmem_limit_bytes=_VMEM_LIMIT,
        ),
    )(x, wqkv)


# ----------------------------------------------------------------------------
# Kernel 2: flash-style causal attention with blocked online softmax.
#   grid = (B, H, q_tiles, kv_tiles), kv axis "arbitrary" (accumulator).
#   q/k/v_ref : (1, 1, tq|tk, HS) bf16      o_ref : (1, 1, tq, HS) bf16
#   m/l scratch : (tq, 1) f32, acc scratch : (tq, HS) f32.
#   The 1/sqrt(n_embd) scale is pre-folded into W_q.
# ----------------------------------------------------------------------------
def _flash_attn_kernel(q_ref, k_ref, v_ref, o_ref, m_ref, l_ref, acc_ref, *,
                       tq, tk, compute_dtype):
    qi = pl.program_id(2)
    ki = pl.program_id(3)
    nk = pl.num_programs(3)

    @pl.when(ki == 0)
    def _init():
        m_ref[...] = jnp.full_like(m_ref, _MASK_VALUE)
        l_ref[...] = jnp.zeros_like(l_ref)
        acc_ref[...] = jnp.zeros_like(acc_ref)

    # Skip fully-masked (strictly above-diagonal) KV blocks entirely.
    @pl.when(ki * tk <= qi * tq + (tq - 1))
    def _compute():
        q = q_ref[0, 0]                                        # (tq, HS) bf16
        k = k_ref[0, 0]                                        # (tk, HS) bf16
        v = v_ref[0, 0]                                        # (tk, HS) bf16
        # q @ k^T without materializing a transpose of k.
        s = jax.lax.dot_general(q, k, (((1,), (1,)), ((), ())),
                                preferred_element_type=jnp.float32)  # (tq, tk)
        rows = qi * tq + jax.lax.broadcasted_iota(jnp.int32, (tq, tk), 0)
        cols = ki * tk + jax.lax.broadcasted_iota(jnp.int32, (tq, tk), 1)
        s = jnp.where(cols <= rows, s, _MASK_VALUE)

        m_prev = m_ref[...]                                    # (tq, 1)
        m_new = jnp.maximum(m_prev, jnp.max(s, axis=-1, keepdims=True))
        alpha = jnp.exp(m_prev - m_new)
        p = jnp.exp(s - m_new)
        l_ref[...] = alpha * l_ref[...] + jnp.sum(p, axis=-1, keepdims=True)
        acc_ref[...] = alpha * acc_ref[...] + jnp.dot(
            p.astype(compute_dtype), v, preferred_element_type=jnp.float32)
        m_ref[...] = m_new

    @pl.when(ki == nk - 1)
    def _finalize():
        o_ref[0, 0] = (acc_ref[...] *
                       pl.reciprocal(l_ref[...], approx=True)).astype(o_ref.dtype)


def flash_attention(q, k, v, *, tile_q=128, tile_k=128,
                    compute_dtype=jnp.bfloat16):
    B, H, T, HS = q.shape
    tq, tk = min(tile_q, T), min(tile_k, T)
    assert T % tq == 0 and T % tk == 0, "T must be divisible by the q/kv tiles"
    nq, nk = T // tq, T // tk

    def q_map(b, h, qi, ki):
        return (b, h, qi, 0)

    def kv_map(b, h, qi, ki):
        # Clamp fully-masked KV blocks to the last useful block so the
        # pipeline does not DMA data whose compute we skip.
        last_needed = (qi * tq + (tq - 1)) // tk
        return (b, h, jnp.minimum(ki, last_needed), 0)

    kernel = functools.partial(_flash_attn_kernel, tq=tq, tk=tk,
                               compute_dtype=compute_dtype)
    return pl.pallas_call(
        kernel,
        out_shape=jax.ShapeDtypeStruct((B, H, T, HS), compute_dtype),
        grid_spec=pltpu.PrefetchScalarGridSpec(
            num_scalar_prefetch=0,
            grid=(B, H, nq, nk),
            in_specs=[
                pl.BlockSpec((1, 1, tq, HS), q_map),
                pl.BlockSpec((1, 1, tk, HS), kv_map),
                pl.BlockSpec((1, 1, tk, HS), kv_map),
            ],
            out_specs=pl.BlockSpec((1, 1, tq, HS), q_map),
            scratch_shapes=[
                pltpu.VMEM((tq, 1), jnp.float32),   # running max m
                pltpu.VMEM((tq, 1), jnp.float32),   # running denom l
                pltpu.VMEM((tq, HS), jnp.float32),  # running PV accumulator
            ],
        ),
        compiler_params=pltpu.CompilerParams(
            dimension_semantics=("parallel", "parallel", "parallel", "arbitrary"),
            vmem_limit_bytes=_VMEM_LIMIT,
        ),
    )(q, k, v)


# ----------------------------------------------------------------------------
# Kernel 3: output projection, K-tiled over heads (consumes the head-split
# slab directly, no HBM transpose).
#   grid = (B, t_tiles, H), h axis "arbitrary" (accumulator).
#   h_ref : (1, 1, tt, HS) bf16   w_ref : (1, HS, C) bf16   b_ref : (1, C) f32
#   o_ref : (1, tt, C) f32        acc   : (tt, C) f32 scratch
# ----------------------------------------------------------------------------
def _proj_kernel(h_ref, w_ref, b_ref, o_ref, acc_ref):
    hi = pl.program_id(2)

    @pl.when(hi == 0)
    def _init():
        acc_ref[...] = jnp.zeros_like(acc_ref)

    acc_ref[...] += jnp.dot(h_ref[0, 0], w_ref[0],
                            preferred_element_type=jnp.float32)

    @pl.when(hi == pl.num_programs(2) - 1)
    def _finalize():
        o_ref[0] = (acc_ref[...] + b_ref[...].astype(jnp.float32)
                    ).astype(o_ref.dtype)


def proj(heads, wp, bp, *, out_dtype, tile_t=512):
    """heads: (B, H, T, HS) bf16; wp: (H, HS, C) bf16; bp: (1, C) -> (B, T, C)."""
    B, H, T, HS = heads.shape
    C = wp.shape[-1]
    tt = min(tile_t, T)
    assert T % tt == 0, "T must be divisible by the projection row tile"
    return pl.pallas_call(
        _proj_kernel,
        out_shape=jax.ShapeDtypeStruct((B, T, C), out_dtype),
        grid_spec=pltpu.PrefetchScalarGridSpec(
            num_scalar_prefetch=0,
            grid=(B, T // tt, H),
            in_specs=[
                pl.BlockSpec((1, 1, tt, HS), lambda b, t, h: (b, h, t, 0)),
                pl.BlockSpec((1, HS, C), lambda b, t, h: (h, 0, 0)),
                pl.BlockSpec((1, C), lambda b, t, h: (0, 0)),
            ],
            out_specs=pl.BlockSpec((1, tt, C), lambda b, t, h: (b, t, 0)),
            scratch_shapes=[pltpu.VMEM((tt, C), jnp.float32)],
        ),
        compiler_params=pltpu.CompilerParams(
            dimension_semantics=("parallel", "parallel", "arbitrary"),
            vmem_limit_bytes=_VMEM_LIMIT,
        ),
    )(heads, wp, bp)


# ----------------------------------------------------------------------------
# MultiHeadAttention forward (eval mode: dropout = identity)
# ----------------------------------------------------------------------------
def multi_head_attention(x, kparams, num_heads, head_size,
                         compute_dtype=jnp.bfloat16):
    q, k, v = qkv_proj(x, kparams["wqkv"], num_heads, head_size,
                       compute_dtype=compute_dtype)            # (B,H,T,HS) bf16
    heads = flash_attention(q, k, v, compute_dtype=compute_dtype)
    return proj(heads, kparams["wp"], kparams["bp"], out_dtype=x.dtype)


# ----------------------------------------------------------------------------
# Parameters: raw f32 (PyTorch-like nn.Linear init) + kernel-ready bf16 prep.
# ----------------------------------------------------------------------------
def init_params(key, num_heads, head_size, n_embd):
    def uni(k, fan_in, shape):
        bound = 1.0 / math.sqrt(fan_in)
        return jax.random.uniform(k, shape, jnp.float32, -bound, bound)

    kq, kk, kv, kpw, kpb = jax.random.split(key, 5)
    wq = uni(kq, n_embd, (num_heads, n_embd, head_size))   # per head: x @ wq[h]
    wk = uni(kk, n_embd, (num_heads, n_embd, head_size))
    wv = uni(kv, n_embd, (num_heads, n_embd, head_size))
    wp = uni(kpw, n_embd, (n_embd, n_embd))                # y = cat @ wp + bp
    bp = uni(kpb, n_embd, (n_embd,))
    return dict(wq=wq, wk=wk, wv=wv, wp=wp, bp=bp)


def prepare_kernel_params(raw, num_heads, head_size, n_embd,
                          compute_dtype=jnp.bfloat16):
    # Fold 1/sqrt(n_embd) into W_q; fuse per-head [Q|K|V]; store bf16 in HBM.
    scale = 1.0 / math.sqrt(n_embd)
    wqkv = jnp.concatenate([raw["wq"] * scale, raw["wk"], raw["wv"]], axis=-1)
    wqkv = wqkv.astype(compute_dtype)                          # (H, C, 3*HS)
    wp = raw["wp"].reshape(num_heads, head_size, n_embd).astype(compute_dtype)
    bp = raw["bp"].reshape(1, n_embd).astype(jnp.float32)
    return dict(wqkv=wqkv, wp=wp, bp=bp)


# ----------------------------------------------------------------------------
# Pure-JAX f32 reference (matches the PyTorch module semantics)
# ----------------------------------------------------------------------------
def reference(x, raw, num_heads, head_size):
    B, T, C = x.shape
    q = jnp.einsum("btc,hcd->bhtd", x, raw["wq"])
    k = jnp.einsum("btc,hcd->bhtd", x, raw["wk"])
    v = jnp.einsum("btc,hcd->bhtd", x, raw["wv"])
    wei = jnp.einsum("bhqd,bhkd->bhqk", q, k) * (C ** -0.5)
    mask = jnp.tril(jnp.ones((T, T), dtype=bool))
    wei = jnp.where(mask[None, None], wei, -jnp.inf)
    wei = jax.nn.softmax(wei, axis=-1)
    out = jnp.einsum("bhqk,bhkd->bhqd", wei, v)
    cat = out.transpose(0, 2, 1, 3).reshape(B, T, num_heads * head_size)
    return cat @ raw["wp"] + raw["bp"]


if __name__ == "__main__":
    B, T = 2, 8
    num_heads, head_size = 4, 8
    n_embd = num_heads * head_size        # 32
    dropout = 0.1                         # inactive in eval mode

    key = jax.random.PRNGKey(0)
    kx, kp = jax.random.split(key)
    x = jax.random.normal(kx, (B, T, n_embd), dtype=jnp.float32)
    raw = init_params(kp, num_heads, head_size, n_embd)
    kparams = prepare_kernel_params(raw, num_heads, head_size, n_embd)

    out = multi_head_attention(x, kparams, num_heads, head_size)
    out = jax.block_until_ready(out)

    ref = reference(x, raw, num_heads, head_size)
    assert out.shape == (B, T, n_embd)
    # bf16 weights/activations on the MXU + approx EUP reciprocal vs. f32 ref.
    err = jnp.max(jnp.abs(out - ref))
    assert jnp.allclose(out, ref, atol=2.5e-2, rtol=2.5e-2), (
        f"mismatch vs reference, max abs err = {err}")

    print("KERNEL_OK")
</pallas_src>

<mosaic_0001>
module attributes {stable_mosaic.version = 11 : i64} {
  func.func @_qkv_proj_kernel(%arg0: i32, %arg1: i32, %arg2: i32, %arg3: memref<1x8x32xf32, #tpu.memory_space<vmem>>, %arg4: memref<1x32x24xbf16, #tpu.memory_space<vmem>>, %arg5: memref<1x1x8x8xbf16, #tpu.memory_space<vmem>>, %arg6: memref<1x1x8x8xbf16, #tpu.memory_space<vmem>>, %arg7: memref<1x1x8x8xbf16, #tpu.memory_space<vmem>>) attributes {dimension_semantics = [#tpu.dimension_semantics<parallel>, #tpu.dimension_semantics<parallel>, #tpu.dimension_semantics<parallel>], iteration_bounds = array<i64: 2, 1, 4>, scalar_prefetch = 0 : i64, scratch_operands = 0 : i64, tpu.core_type = #tpu.core_type<tc>, window_params = [{transform_indices = @transform_0, window_bounds = array<i64: 1, 8, 32>}, {transform_indices = @transform_1, window_bounds = array<i64: 1, 32, 24>}, {transform_indices = @transform_2, window_bounds = array<i64: 1, 1, 8, 8>}, {transform_indices = @transform_3, window_bounds = array<i64: 1, 1, 8, 8>}, {transform_indices = @transform_4, window_bounds = array<i64: 1, 1, 8, 8>}]} {
    %c0 = arith.constant 0 : index
    %c0_0 = arith.constant 0 : index
    %c0_1 = arith.constant 0 : index
    %0 = vector.load %arg3[%c0, %c0_0, %c0_1] : memref<1x8x32xf32, #tpu.memory_space<vmem>>, vector<1x8x32xf32>
    %1 = vector.shape_cast %0 : vector<1x8x32xf32> to vector<8x32xf32>
    %2 = arith.truncf %1 : vector<8x32xf32> to vector<8x32xbf16>
    %c0_2 = arith.constant 0 : index
    %c0_3 = arith.constant 0 : index
    %c0_4 = arith.constant 0 : index
    %3 = vector.load %arg4[%c0_2, %c0_3, %c0_4] : memref<1x32x24xbf16, #tpu.memory_space<vmem>>, vector<1x32x24xbf16>
    %4 = vector.shape_cast %3 : vector<1x32x24xbf16> to vector<32x24xbf16>
    %cst = arith.constant dense<0.000000e+00> : vector<8x24xf32>
    %5 = tpu.matmul %2, %4, %cst {dimension_numbers = #tpu.dot_dimension_numbers<[1], [0], [0], [1], [0, 0, 1, 1], [], []>} : vector<8x32xbf16>, vector<32x24xbf16>, vector<8x24xf32> -> vector<8x24xf32>
    %6 = vector.extract_strided_slice %5 {offsets = [0, 0], sizes = [8, 8], strides = [1, 1]} : vector<8x24xf32> to vector<8x8xf32>
    %7 = arith.truncf %6 : vector<8x8xf32> to vector<8x8xbf16>
    %c0_5 = arith.constant 0 : index
    %c0_6 = arith.constant 0 : index
    %c0_7 = arith.constant 0 : index
    %c0_8 = arith.constant 0 : index
    %8 = vector.load %arg5[%c0_5, %c0_6, %c0_7, %c0_8] : memref<1x1x8x8xbf16, #tpu.memory_space<vmem>>, vector<1x1x8x8xbf16>
    %9 = vector.shape_cast %8 : vector<1x1x8x8xbf16> to vector<8x8xbf16>
    %10 = vector.shape_cast %7 : vector<8x8xbf16> to vector<1x1x8x8xbf16>
    tpu.vector_store %arg5[%c0_5, %c0_6, %c0_7, %c0_8], %10 {strides = array<i32>} : memref<1x1x8x8xbf16, #tpu.memory_space<vmem>>, vector<1x1x8x8xbf16>,
    %11 = vector.extract_strided_slice %5 {offsets = [0, 8], sizes = [8, 8], strides = [1, 1]} : vector<8x24xf32> to vector<8x8xf32>
    %12 = arith.truncf %11 : vector<8x8xf32> to vector<8x8xbf16>
    %c0_9 = arith.constant 0 : index
    %c0_10 = arith.constant 0 : index
    %c0_11 = arith.constant 0 : index
    %c0_12 = arith.constant 0 : index
    %13 = vector.load %arg6[%c0_9, %c0_10, %c0_11, %c0_12] : memref<1x1x8x8xbf16, #tpu.memory_space<vmem>>, vector<1x1x8x8xbf16>
    %14 = vector.shape_cast %13 : vector<1x1x8x8xbf16> to vector<8x8xbf16>
    %15 = vector.shape_cast %12 : vector<8x8xbf16> to vector<1x1x8x8xbf16>
    tpu.vector_store %arg6[%c0_9, %c0_10, %c0_11, %c0_12], %15 {strides = array<i32>} : memref<1x1x8x8xbf16, #tpu.memory_space<vmem>>, vector<1x1x8x8xbf16>,
    %16 = vector.extract_strided_slice %5 {offsets = [0, 16], sizes = [8, 8], strides = [1, 1]} : vector<8x24xf32> to vector<8x8xf32>
    %17 = arith.truncf %16 : vector<8x8xf32> to vector<8x8xbf16>
    %c0_13 = arith.constant 0 : index
    %c0_14 = arith.constant 0 : index
    %c0_15 = arith.constant 0 : index
    %c0_16 = arith.constant 0 : index
    %18 = vector.load %arg7[%c0_13, %c0_14, %c0_15, %c0_16] : memref<1x1x8x8xbf16, #tpu.memory_space<vmem>>, vector<1x1x8x8xbf16>
    %19 = vector.shape_cast %18 : vector<1x1x8x8xbf16> to vector<8x8xbf16>
    %20 = vector.shape_cast %17 : vector<8x8xbf16> to vector<1x1x8x8xbf16>
    tpu.vector_store %arg7[%c0_13, %c0_14, %c0_15, %c0_16], %20 {strides = array<i32>} : memref<1x1x8x8xbf16, #tpu.memory_space<vmem>>, vector<1x1x8x8xbf16>,
    return
  }
  func.func @transform_0(%arg0: i32, %arg1: i32, %arg2: i32) -> (i32, i32, i32) {
    %c0_i32 = arith.constant 0 : i32
    %c0_i32_0 = arith.constant 0 : i32
    return %arg0, %arg1, %c0_i32 : i32, i32, i32
  }
  func.func @transform_1(%arg0: i32, %arg1: i32, %arg2: i32) -> (i32, i32, i32) {
    %c0_i32 = arith.constant 0 : i32
    %c0_i32_0 = arith.constant 0 : i32
    %c0_i32_1 = arith.constant 0 : i32
    return %arg2, %c0_i32, %c0_i32_0 : i32, i32, i32
  }
  func.func @transform_2(%arg0: i32, %arg1: i32, %arg2: i32) -> (i32, i32, i32, i32) {
    %c0_i32 = arith.constant 0 : i32
    %c0_i32_0 = arith.constant 0 : i32
    return %arg0, %arg2, %arg1, %c0_i32 : i32, i32, i32, i32
  }
  func.func @transform_3(%arg0: i32, %arg1: i32, %arg2: i32) -> (i32, i32, i32, i32) {
    %c0_i32 = arith.constant 0 : i32
    %c0_i32_0 = arith.constant 0 : i32
    return %arg0, %arg2, %arg1, %c0_i32 : i32, i32, i32, i32
  }
  func.func @transform_4(%arg0: i32, %arg1: i32, %arg2: i32) -> (i32, i32, i32, i32) {
    %c0_i32 = arith.constant 0 : i32
    %c0_i32_0 = arith.constant 0 : i32
    return %arg0, %arg2, %arg1, %c0_i32 : i32, i32, i32, i32
  }
}

</mosaic_0001>

<bundles_post_ra>
// kernel: tpu_custom_call.1
= control target key start
LH: loop header
LB: loop body
LE: loop exit
PB: predicated region body
PF: predicated region fallthrough
CT: control target
= control target key end

     0   :  { %10 = vsyncpa [#allocation3], 0  ;;  %s1112_s0 = inlined_call_operand.vmem [shape: f32[2,8,32], index: 0, kind: input, shape index: {}]   ;;  %s1113_s1 = inlined_call_operand.vmem [shape: bf16[4,32,24], index: 1, kind: input, shape index: {}]   ;;  %s1114_s2 = inlined_call_operand.hbm [shape: bf16[2,4,8,8], index: 2, kind: output, shape index: {0}]   ;;  %s1115_s3 = inlined_call_operand.hbm [shape: bf16[2,4,8,8], index: 3, kind: output, shape index: {1}]   ;;  %s1116_s4 = inlined_call_operand.hbm [shape: bf16[2,4,8,8], index: 4, kind: output, shape index: {2}]  }
   0x1   :  { %12 = vsyncpa [#allocation3 + $0x1], 0 }
   0x2   :  { %13 = vsyncpa [#allocation5], 0 }
   0x3   :  { %15 = vsyncpa [#allocation5 + $0x1], 0  ;;  %s881_s15 = smov 0   ;;  %s883_s16 = smov 0  }
   0x4   :  { %s885_s17 = smov 0   ;;  %s887_s18 = smov 0  }
   0x5   :  { %s889_s19 = smov 0   ;;  %s891_s20 = smov 0  }
   0x6   :  { %s893_s21 = smov 0   ;;  %s895_s22 = smov 0  }
   0x7 LB: > { %s567_s23 = sadd.s32 4294967295, %s847_s22   ;;  %s1117_s24 = sadd.s32 4294967294, %s847_s22   ;;  %s847_s22 = sphi %s895_s22, %s21_s22   ;;  %s843_s21 = sphi %s893_s21, %s1129_s21   ;;  %s839_s20 = sphi %s891_s20, %s1128_s20   ;;  %s835_s19 = sphi %s889_s19, %s1127_s19   ;;  %s831_s18 = sphi %s887_s18, %s1126_s18   ;;  %s827_s17 = sphi %s885_s17, %s1125_s17   ;;  %s823_s16 = sphi %s883_s16, %s1124_s16   ;;  %s819_s15 = sphi %s881_s15, %s1123_s15  }
   0x8   : > { %s33_s25 = sadd.s32 1, %s839_s20  ;;  %s40_s26 = sadd.s32 1, %s843_s21 }
   0x9   : > { %p34_p0 = scmp.ge.s32.totalorder %s33_s25, 4  ;;  %p115_p1 = scmp.ne.s32.totalorder %s827_s17, %s823_s16 }
   0xa   : > { %p116_p2 = scmp.eq.s32.totalorder %s567_s23, 7  ;;  %p121_p5 = scmp.ne.s32.totalorder %s823_s16, %s819_s15 }
   0xb   : > { %s1131_s25 = smov (%p34_p0, %s33_s25), 0  ;;  %s1133_s26 = smov (!%p34_p0, %s40_s26), %s843_s21 }
   0xc   : > { %s99_s27 = ssub.s32 %s839_s20, %s1131_s25  ;;  %p934_p3 = por %p116_p2, %p115_p1 }
   0xd   : > { %p42_p4 = scmp.ge.s32.totalorder %s1133_s26, 2  ;;  %p122_p6 = scmp.eq.s32.totalorder %s1117_s24, 7 }
   0xe   : > { %p571_p7 = scmp.ge.s32.totalorder %s847_s22, 1  ;;  %p218_p9 = scmp.lt.s32.totalorder %s847_s22, 9 }
   0xf   : > { %s1135_s26 = smov (%p42_p4, %s1133_s26), 0  ;;  %p945_p8 = por %p122_p6, %p121_p5 }
  0x10   : > { %s98_s30 = ssub.s32 %s843_s21, %s1135_s26  ;;  %s105_s5 = sadd.s32 1, %s827_s17 }
  0x11   : > { %s100_s6 = sor.u32 %s99_s27, %s98_s30  ;;  %p219_p10 = pnand %p571_p7, %p218_p9 }
  0x12   : > { %p103_p11 = scmp.eq.s32.totalorder %s100_s6, 0  ;;  %p268_p12 = scmp.lt.s32.totalorder (!%p219_p10), %s831_s18, 3  ;;  %v849_v0 = vmov (!%p219_p10), 0.0   ;;  %vm850_vm0 = vmmov (!%p219_p10), 0   ;;  %vm292_vm1 = vcmask (!%p219_p10), 261120   ;;  %vm337_vm2 = vcmask (!%p219_p10), 60416  }
  0x13   : > { %222 = sbr.rel (%p219_p10) target bundleno = 404 (0x194), region = 28  ;;  %p261_p13 = scmp.lt.s32.totalorder (!%p219_p10), %s835_s19, 1  ;;  %598 = vmatprep.subr.bf16.mxu0 (!%p219_p10), %v849_v0  ;;  %602 = vmatprep.mubr.msk.bf16.mxu0 (!%p219_p10), %vm850_vm0, %v849_v0 }
  0x14   : > { %s954_s7 = scalar_select %p103_p11, %s827_s17, %s105_s5  }
  0x15   : > { %s244_s6 = sand.u32 (!%p219_p10), 1, %s823_s16  }
  0x16   : > { %s968_s24 = sshll.u32 (!%p219_p10), %s244_s6, 2 }
  0x17   : > { %s246_s11 = scalar_lea.vmem (!%p219_p10), [#allocation2], %s968_s24 }
  0x18   : > { %s377_s12 = sshll.u32 (!%p219_p10), %s246_s11, 4  ;;  %s980_s12 = int_to_ptr.vmem [resolvable:$true] %s377_s12 }
  0x19   : > { %s693_s30 = scalar_lea.vmem (!%p219_p10), %s980_s12, 64 }
  0x1a   : > { %s269_s8 = scalar_select %p268_p12, %s831_s18, 3 }
  0x1b   : > { %s262_s9 = scalar_select %p261_p13, %s835_s19, 1 }
  0x1c   : > { %s593_s10 = sshll.u32 %s269_s8, 4  ;;  %s585_s8 = sshll.u32 %s835_s19, 2 }
  0x1d   : > { %s272_s13 = scalar_lea.vmem %s1113_s1, %s593_s10  ;;  %s575_s14 = sshll.u32 %s262_s9, 3 }
  0x1e   : > { %v691_v1 = vld [vmem:[%s272_s13] sm:$0xff]   ;;  %s267_s5 = scalar_lea.vmem %s1112_s0, %s575_s14  ;;  %v692_v2 = vld [vmem:[%s272_s13 + $0x8] sm:$0xff]   ;;  %s373_s10 = sadd.s32 %s831_s18, %s585_s8 }
  0x1f   : > { %599 = vmatpush3.bf16.msra.mxu0 %v691_v1  ;;  %v274_v3 = vld [vmem:[%s267_s5] sm:$0xff]  ;;  %s971_s9 = sshll.u32 %s373_s10, 6  ;;  %s851_s18 = smov 120  }
  0x20   : > { %600 = vmatprep.subr.bf16.mxu0 %v849_v0  ;;  %v275_v4 = vpack.c.bf16 %v274_v3, %v274_v3  ;;  %s978_s27 = scalar_lea.hbm %s1114_s2, %s971_s9  ;;  %s351_s19 = scalar_lea.sflag [#allocation3], %s244_s6 }
  0x21   : > { %p694_p0 = scmp.ne.s32.totalorder %s980_s12, %s693_s30  ;;  %s852_s5 = smov [#allocation2]  }
  0x22   : > { %s697_s8 = sshll.u32 %s852_s5, 4  ;;  %s698_s8 = int_to_ptr.vmem [resolvable:$false] %s697_s8 }
  0x23   : > { %601 = vmatpush3.bf16.msra.mxu0 %v692_v2  ;;  %p695_p1 = pnand %p694_p0, %p934_p3  ;;  %s699_s10 = scalar_lea.vmem %s698_s8, 128 }
  0x24   : > { %p700_p4 = scmp.lt.s32.totalorder %s980_s12, %s698_s8  ;;  %p701_p5 = scmp.lt.s32.totalorder %s699_s10, %s693_s30 }
  0x25   : > { %p696_p2 = pneg %p695_p1 }
  0x26   : > { %603 = vmatmul.mubr.msk.bf16.vlgmr.msra.gmra.mrb[0].mxu0 %vm292_vm1, %v275_v4  ;;  %p702_p6 = por %p701_p5, %p700_p4 }
  0x28   : > { %p703_p7 = pnand %p702_p6, %p696_p2 }
  0xf9   : > { %v330_v5 = vpop.f32.mrb[0].mxu0 }
  0xfa   : > { %v336_v6 = vpack.c.bf16 %v330_v5, %v330_v5  ;;  %v604_v7 = vpop.f32.mrb[1].mxu0 }
  0xfb   : > { %v333_v8 = vpop.f32.mrb[2].mxu0 }
  0xfc   : > { %342 = vrot.lane.b32.xlu0 %v336_v6, %s851_s18  ;;  %v605_v9 = vpop.f32.mrb[3].mxu0  ;;  %338 = vst.msk [vmem:[%s246_s11] sm:$0xf] %vm337_vm2, %v336_v6 }
  0xfd   : > { %706 = shalt.err (!%p703_p7)
}
  0xfe   : > { %s707_s6 = scalar_lea.hbm %s978_s27, 64  ;;  %s711_s14 = scalar_lea.hbm %s1114_s2, 512 }
  0xff   : > { %p708_p9 = scmp.ne.s32.totalorder %s978_s27, %s707_s6  ;;  %p712_p12 = scmp.lt.u32.totalorder %s978_s27, %s1114_s2 }
 0x100   : > { %p713_p13 = scmp.lt.u32.totalorder %s711_s14, %s707_s6  ;;  %p715_p1 = scmp.lt.u32.totalorder %s707_s6, %s978_s27 }
 0x101   : > { %p709_p10 = pnand %p708_p9, %p934_p3 }
 0x102   : > { %p714_p0 = por %p713_p13, %p712_p12 }
 0x103   : > { %p710_p11 = pneg %p709_p10 }
 0x104   : > { %p716_p2 = por %p715_p1, %p714_p0 }
 0x106   : > { %p717_p4 = pnand %p716_p2, %p710_p11 }
 0x108   : > { %720 = shalt.err (!%p717_p4)
}
 0x109   : > { %606 = dma.vmem_to_hbm [thread:$0]  (%p934_p3), %s980_s12, 64, %s978_s27, %s351_s19  }
 0x10a   : > { %s853_s30 = smov 112   ;;  %s1006_s8 = sand.u32 1, %s567_s23  }
 0x10b   : > { %346 = vrot.lane.b32.xlu0 %v336_v6, %s853_s30  ;;  %s253_s10 = scalar_lea.vmem [#allocation4], %s968_s24  ;;  %s1013_s14 = scalar_lea.hbm %s1115_s3, %s971_s9 }
 0x10c   : > { %s393_s6 = sshll.u32 %s253_s10, 4  ;;  %s1118_s12 = scalar_lea.vmem [#allocation6], %s968_s24  ;;  %s1015_s6 = int_to_ptr.vmem [resolvable:$true] %s393_s6 }
 0x10d   : > { %s1020_s27 = sshll.u32 %s1118_s12, 4  ;;  %s356_s23 = scalar_lea.sflag [#allocation5], %s1006_s8  ;;  %s1048_s27 = int_to_ptr.vmem [resolvable:$true] %s1020_s27 }
 0x10e   : > { %s721_s19 = scalar_lea.vmem %s1015_s6, 64  ;;  %s854_s18 = smov [#allocation4]  }
 0x10f   : > { %p722_p5 = scmp.ne.s32.totalorder %s1015_s6, %s721_s19  ;;  %s725_s5 = sshll.u32 %s854_s18, 4  ;;  %s726_s5 = int_to_ptr.vmem [resolvable:$false] %s725_s5 }
 0x110   : > { %s727_s30 = scalar_lea.vmem %s726_s5, 128  ;;  %p728_p9 = scmp.lt.s32.totalorder %s1015_s6, %s726_s5 }
 0x111   : > { %p723_p6 = pnand %p722_p5, %p934_p3  ;;  %p729_p10 = scmp.lt.s32.totalorder %s727_s30, %s721_s19 }
 0x113   : > { %p724_p7 = pneg %p723_p6  ;;  %p730_p11 = por %p729_p10, %p728_p9 }
 0x115   : > { %p731_p12 = pnand %p730_p11, %p724_p7 }
 0x16e   : > { %v343_v10 = vpop.permute.xlu0 %342 }
 0x16f   : > { %345 = vst.msk [vmem:[%s253_s10] sm:$0xf] %vm337_vm2, %v343_v10 }
 0x170   : > { %734 = shalt.err (!%p731_p12)
}
 0x171   : > { %s735_s10 = scalar_lea.hbm %s1013_s14, 64  ;;  %s739_s18 = scalar_lea.hbm %s1115_s3, 512 }
 0x172   : > { %p736_p13 = scmp.ne.s32.totalorder %s1013_s14, %s735_s10  ;;  %p740_p2 = scmp.lt.u32.totalorder %s1013_s14, %s1115_s3 }
 0x173   : > { %p741_p4 = scmp.lt.u32.totalorder %s739_s18, %s735_s10  ;;  %p743_p6 = scmp.lt.u32.totalorder %s735_s10, %s1013_s14 }
 0x174   : > { %p737_p0 = pnand %p736_p13, %p934_p3 }
 0x175   : > { %p742_p5 = por %p741_p4, %p740_p2 }
 0x176   : > { %p738_p1 = pneg %p737_p0 }
 0x177   : > { %p744_p7 = por %p743_p6, %p742_p5 }
 0x179   : > { %p745_p9 = pnand %p744_p7, %p738_p1 }
 0x17b   : > { %748 = shalt.err (!%p745_p9)
}
 0x17c   : > { %607 = dma.vmem_to_hbm [thread:$0]  (%p934_p3), %s1015_s6, 64, %s1013_s14, %s356_s23  }
 0x17d   : > { %s1054_s30 = scalar_lea.hbm %s1116_s4, %s971_s9  ;;  %v347_v11 = vpop.permute.xlu0 %346  ;;  %s1121_s10 = scalar_lea.vmem [#allocation6], %s968_s24 }
 0x17e   : > { %349 = vst.msk [vmem:[%s1121_s10] sm:$0xf] %vm337_vm2, %v347_v11  ;;  %s749_s11 = scalar_lea.vmem %s1048_s27, 64  ;;  %s855_s6 = smov [#allocation6]  }
 0x17f   : > { %p750_p10 = scmp.ne.s32.totalorder %s1048_s27, %s749_s11  ;;  %s753_s14 = sshll.u32 %s855_s6, 4  ;;  %s754_s14 = int_to_ptr.vmem [resolvable:$false] %s753_s14 }
 0x180   : > { %s755_s13 = scalar_lea.vmem %s754_s14, 128  ;;  %p756_p13 = scmp.lt.s32.totalorder %s1048_s27, %s754_s14 }
 0x181   : > { %p751_p11 = pnand %p750_p10, %p934_p3  ;;  %p757_p0 = scmp.lt.s32.totalorder %s755_s13, %s749_s11 }
 0x183   : > { %p752_p12 = pneg %p751_p11  ;;  %p758_p1 = por %p757_p0, %p756_p13 }
 0x185   : > { %p759_p2 = pnand %p758_p1, %p752_p12 }
 0x187   : > { %762 = shalt.err (!%p759_p2)
}
 0x188   : > { %s763_s24 = scalar_lea.hbm %s1054_s30, 64  ;;  %s767_s5 = scalar_lea.hbm %s1116_s4, 512 }
 0x189   : > { %p764_p4 = scmp.ne.s32.totalorder %s1054_s30, %s763_s24  ;;  %p768_p7 = scmp.lt.u32.totalorder %s1054_s30, %s1116_s4 }
 0x18a   : > { %p769_p9 = scmp.lt.u32.totalorder %s767_s5, %s763_s24  ;;  %p771_p11 = scmp.lt.u32.totalorder %s763_s24, %s1054_s30 }
 0x18b   : > { %p765_p5 = pnand %p764_p4, %p934_p3 }
 0x18c   : > { %p770_p10 = por %p769_p9, %p768_p7 }
 0x18d   : > { %p766_p6 = pneg %p765_p5 }
 0x18e   : > { %p772_p12 = por %p771_p11, %p770_p10 }
 0x190   : > { %p773_p13 = pnand %p772_p12, %p766_p6 }
 0x192   : > { %776 = shalt.err (!%p773_p13)
}
 0x193   : > { %608 = dma.vmem_to_hbm [thread:$0]  (%p934_p3), %s1048_s27, 64, %s1054_s30, %s356_s23  }
 0x194 PF: > { %p622_p0 = scmp.ge.s32.totalorder %s847_s22, 2  ;;  %s421_s10 = sand.u32 1, %s819_s15  }
 0x195   : > { %s422_s11 = scalar_lea.sflag [#allocation3], %s421_s10 }
 0x196   : > { %p613_p1 = pnand %p622_p0, %p945_p8 }
 0x198   : > { %810 = dma.done.wait (!%p613_p1), %s422_s11, 64  }
 0x199   : > { %812 = vsyncadd (!%p613_p1), %s422_s11, 4294967232  ;;  %s1122_s6 = sadd.s32 4294967294, %s847_s22  }
 0x19a   : > { %s430_s14 = sand.u32 1, %s1122_s6  }
 0x19b   : > { %s431_s28 = scalar_lea.sflag [#allocation5], %s430_s14 }
 0x19c   : > { %814 = dma.done.wait (!%p613_p1), %s431_s28, 128  }
 0x19d   : > { %816 = vsyncadd (!%p613_p1), %s431_s28, 4294967168  ;;  %s21_s22 = sadd.s32 1, %s847_s22   ;;  %s1123_s15 = smov %s823_s16 }
 0x19e   : > { %p18_p3 = scmp.ge.s32.totalorder %s21_s22, 10   ;;  %s1124_s16 = smov %s827_s17 }
 0x19f   : > { %s1125_s17 = smov %s954_s7  ;;  %s1126_s18 = smov %s839_s20 }
 0x1a0   : > { %s1127_s19 = smov %s843_s21  ;;  %s1128_s20 = smov %s1131_s25 }
 0x1a1   : > { %s1129_s21 = smov %s1135_s26  ;;  %20 = sbr.rel (!%p18_p3) target bundleno = 7 (0x7), region = 98 }
 0x1a8   :  { %445 = vsyncpa [#allocation3], 1 }
 0x1a9   :  { %447 = vsyncpa [#allocation3 + $0x1], 1 }
 0x1aa   :  { %448 = vsyncpa [#allocation5], 1 }
 0x1ab   :  { %450 = vsyncpa [#allocation5 + $0x1], 1 }

</bundles_post_ra>
